<compile_context>
chip_gen: v5e
topology: v5e:2x2
jax: 0.10.0
libtpu: 0.0.40
codegen_flags: <defaults>
</compile_context>

<pallas_src>
import jax
import jax.numpy as jnp
from jax.experimental import pallas as pl
from jax.experimental.pallas import tpu as pltpu

_EPS = 1e-5


def _rescale_kernel(x_ref, r_ref, o_ref):
    # x_ref, r_ref, o_ref: (tile_rows, HW) VMEM tiles; HW is the full spatial size.
    x = x_ref[...].astype(jnp.float32)
    r = r_ref[...].astype(jnp.float32)
    hw = x.shape[-1]
    inv_hwm1 = jnp.float32(1.0 / (hw - 1))

    # Two-pass moments per (n, c) row over the spatial axis (numerically safe;
    # the tiles are already resident in VMEM so this costs no extra HBM traffic).
    mx = jnp.mean(x, axis=-1, keepdims=True)
    dx = x - mx
    vx = jnp.mean(dx * dx, axis=-1, keepdims=True)            # biased (GroupNorm)

    mr = jnp.mean(r, axis=-1, keepdims=True)
    dr = r - mr
    vr = jnp.sum(dr * dr, axis=-1, keepdims=True) * inv_hwm1  # unbiased (torch .std)

    # Fused re-scale: norm(x) * std_ref + mean_ref == (x - mx) * sqrt(vr / (vx + eps)) + mr
    s = jnp.sqrt(vr / (vx + _EPS))
    o_ref[...] = (dx * s + mr).astype(o_ref.dtype)


def rescale2d(x: jax.Array, ref: jax.Array) -> jax.Array:
    """Pallas implementation of ReScale2D.forward(x, ref). x, ref: (N, C, H, W)."""
    assert x.shape == ref.shape, "x and ref must have the same shape"
    N, C, H, W = x.shape
    NC, HW = N * C, H * W
    assert HW > 1, "unbiased std of a single spatial element is undefined (matches torch NaN)"

    x2 = x.reshape(NC, HW)
    r2 = ref.reshape(NC, HW)

    # ---- Tile sizing: small tiles, deep grid (HBM-bandwidth-bound kernel) ----
    itemsize = x2.dtype.itemsize
    # Sublane packing: 8 rows/vreg for 4-byte, 16 for 2-byte, 32 for 1-byte dtypes.
    row_align = max(8, 32 // max(itemsize, 1))
    row_bytes = HW * itemsize

    TILE_BYTES_CAP = 2 * 1024 * 1024   # ~2 MiB per buffer keeps us at mem-bound roofline
    TARGET_STEPS = 8                   # >= 8 grid steps (>= 4 per TC on v7x) when possible

    rows_cap = max(row_align, (TILE_BYTES_CAP // max(row_bytes, 1)) // row_align * row_align)
    rows_for_steps = pl.cdiv(pl.cdiv(NC, TARGET_STEPS), row_align) * row_align
    tile_rows = max(row_align, min(rows_cap, rows_for_steps))
    # Never bigger than the row-aligned problem itself.
    tile_rows = min(tile_rows, pl.cdiv(NC, row_align) * row_align)

    grid_rows = pl.cdiv(NC, tile_rows)
    if grid_rows > 1 and grid_rows % 2 == 1:
        # Prefer an even step count so v7x's two TensorCores stay balanced.
        alt_rows = pl.cdiv(pl.cdiv(NC, grid_rows + 1), row_align) * row_align
        if row_align <= alt_rows < tile_rows and pl.cdiv(NC, alt_rows) % 2 == 0:
            tile_rows = alt_rows
            grid_rows = pl.cdiv(NC, alt_rows)

    # Modest scoped-VMEM limit: double-buffered IO (3 arrays) + f32 intermediates + margin.
    tile_bytes = tile_rows * HW * itemsize
    f32_tile_bytes = tile_rows * HW * 4
    vmem_need = 2 * 3 * tile_bytes + 4 * f32_tile_bytes + (2 << 20)
    vmem_limit = int(min(48 << 20, max(16 << 20, vmem_need)))

    out2 = pl.pallas_call(
        _rescale_kernel,
        out_shape=jax.ShapeDtypeStruct((NC, HW), x.dtype),
        grid_spec=pl.GridSpec(
            grid=(grid_rows,),
            in_specs=[
                pl.BlockSpec((tile_rows, HW), lambda i: (i, 0)),
                pl.BlockSpec((tile_rows, HW), lambda i: (i, 0)),
            ],
            out_specs=pl.BlockSpec((tile_rows, HW), lambda i: (i, 0)),
        ),
        compiler_params=pltpu.CompilerParams(
            dimension_semantics=("parallel",),
            vmem_limit_bytes=vmem_limit,
        ),
    )(x2, r2)

    return out2.reshape(N, C, H, W)


def _reference(x, ref):
    # Pure-JAX reference mirroring the PyTorch forward (two-pass variance).
    xf = x.astype(jnp.float32)
    rf = ref.astype(jnp.float32)
    mx = jnp.mean(xf, axis=(-1, -2), keepdims=True)
    vx = jnp.mean((xf - mx) ** 2, axis=(-1, -2), keepdims=True)
    xn = (xf - mx) / jnp.sqrt(vx + _EPS)
    mr = jnp.mean(rf, axis=(-1, -2), keepdims=True)
    hw = rf.shape[-1] * rf.shape[-2]
    vr = jnp.sum((rf - mr) ** 2, axis=(-1, -2), keepdims=True) / (hw - 1)
    return (xn * jnp.sqrt(vr) + mr).astype(x.dtype)


if __name__ == "__main__":
    # ReScale2D(_in=C) has no learnable parameters (GroupNorm affine=False),
    # so there is nothing to initialize beyond the inputs.
    key = jax.random.PRNGKey(0)
    kx, kr = jax.random.split(key)
    N, C, H, W = 2, 4, 16, 16
    x = jax.random.normal(kx, (N, C, H, W), dtype=jnp.float32) * 2.0 + 1.0
    ref = jax.random.normal(kr, (N, C, H, W), dtype=jnp.float32) * 5.0 - 3.0

    out = rescale2d(x, ref)
    out = jax.block_until_ready(out)

    expect = _reference(x, ref)
    assert out.shape == (N, C, H, W)
    assert jnp.allclose(out, expect, atol=1e-4, rtol=1e-4), "mismatch vs reference"

    print("KERNEL_OK")
</pallas_src>

<mosaic_0001>
module attributes {stable_mosaic.version = 11 : i64} {
  func.func @_rescale_kernel(%arg0: i32, %arg1: memref<8x256xf32, #tpu.memory_space<vmem>>, %arg2: memref<8x256xf32, #tpu.memory_space<vmem>>, %arg3: memref<8x256xf32, #tpu.memory_space<vmem>>) attributes {dimension_semantics = [#tpu.dimension_semantics<parallel>], iteration_bounds = array<i64: 1>, scalar_prefetch = 0 : i64, scratch_operands = 0 : i64, tpu.core_type = #tpu.core_type<tc>, window_params = [{transform_indices = @transform_0, window_bounds = array<i64: 8, 256>}, {transform_indices = @transform_1, window_bounds = array<i64: 8, 256>}, {transform_indices = @transform_2, window_bounds = array<i64: 8, 256>}]} {
    %c0 = arith.constant 0 : index
    %c0_0 = arith.constant 0 : index
    %0 = vector.load %arg1[%c0, %c0_0] : memref<8x256xf32, #tpu.memory_space<vmem>>, vector<8x256xf32>
    %c0_1 = arith.constant 0 : index
    %c0_2 = arith.constant 0 : index
    %1 = vector.load %arg2[%c0_1, %c0_2] : memref<8x256xf32, #tpu.memory_space<vmem>>, vector<8x256xf32>
    %cst = arith.constant dense<0.000000e+00> : vector<8xf32>
    %2 = vector.multi_reduction <add>, %0, %cst [1] : vector<8x256xf32> to vector<8xf32>
    %3 = vector.shape_cast %2 : vector<8xf32> to vector<8x1xf32>
    %cst_3 = arith.constant 2.560000e+02 : f32
    %4 = vector.broadcast %cst_3 : f32 to vector<8x1xf32>
    %5 = arith.divf %3, %4 : vector<8x1xf32>
    %6 = vector.broadcast %5 : vector<8x1xf32> to vector<8x256xf32>
    %7 = arith.subf %0, %6 : vector<8x256xf32>
    %8 = arith.mulf %7, %7 : vector<8x256xf32>
    %cst_4 = arith.constant dense<0.000000e+00> : vector<8xf32>
    %9 = vector.multi_reduction <add>, %8, %cst_4 [1] : vector<8x256xf32> to vector<8xf32>
    %10 = vector.shape_cast %9 : vector<8xf32> to vector<8x1xf32>
    %cst_5 = arith.constant 2.560000e+02 : f32
    %11 = vector.broadcast %cst_5 : f32 to vector<8x1xf32>
    %12 = arith.divf %10, %11 : vector<8x1xf32>
    %cst_6 = arith.constant dense<0.000000e+00> : vector<8xf32>
    %13 = vector.multi_reduction <add>, %1, %cst_6 [1] : vector<8x256xf32> to vector<8xf32>
    %14 = vector.shape_cast %13 : vector<8xf32> to vector<8x1xf32>
    %cst_7 = arith.constant 2.560000e+02 : f32
    %15 = vector.broadcast %cst_7 : f32 to vector<8x1xf32>
    %16 = arith.divf %14, %15 : vector<8x1xf32>
    %17 = vector.broadcast %16 : vector<8x1xf32> to vector<8x256xf32>
    %18 = arith.subf %1, %17 : vector<8x256xf32>
    %19 = arith.mulf %18, %18 : vector<8x256xf32>
    %cst_8 = arith.constant dense<0.000000e+00> : vector<8xf32>
    %20 = vector.multi_reduction <add>, %19, %cst_8 [1] : vector<8x256xf32> to vector<8xf32>
    %21 = vector.shape_cast %20 : vector<8xf32> to vector<8x1xf32>
    %cst_9 = arith.constant 0.00392156886 : f32
    %22 = vector.broadcast %cst_9 : f32 to vector<8x1xf32>
    %23 = arith.mulf %21, %22 : vector<8x1xf32>
    %cst_10 = arith.constant 9.99999974E-6 : f32
    %24 = vector.broadcast %cst_10 : f32 to vector<8x1xf32>
    %25 = arith.addf %12, %24 : vector<8x1xf32>
    %26 = arith.divf %23, %25 : vector<8x1xf32>
    %27 = math.sqrt %26 : vector<8x1xf32>
    %28 = vector.broadcast %27 : vector<8x1xf32> to vector<8x256xf32>
    %29 = arith.mulf %7, %28 : vector<8x256xf32>
    %30 = vector.broadcast %16 : vector<8x1xf32> to vector<8x256xf32>
    %31 = arith.addf %29, %30 : vector<8x256xf32>
    %c0_11 = arith.constant 0 : index
    %c0_12 = arith.constant 0 : index
    %32 = vector.load %arg3[%c0_11, %c0_12] : memref<8x256xf32, #tpu.memory_space<vmem>>, vector<8x256xf32>
    tpu.vector_store %arg3[%c0_11, %c0_12], %31 {strides = array<i32>} : memref<8x256xf32, #tpu.memory_space<vmem>>, vector<8x256xf32>,
    return
  }
  func.func @transform_0(%arg0: i32) -> (i32, i32) {
    %c0_i32 = arith.constant 0 : i32
    %c0_i32_0 = arith.constant 0 : i32
    return %arg0, %c0_i32 : i32, i32
  }
  func.func @transform_1(%arg0: i32) -> (i32, i32) {
    %c0_i32 = arith.constant 0 : i32
    %c0_i32_0 = arith.constant 0 : i32
    return %arg0, %c0_i32 : i32, i32
  }
  func.func @transform_2(%arg0: i32) -> (i32, i32) {
    %c0_i32 = arith.constant 0 : i32
    %c0_i32_0 = arith.constant 0 : i32
    return %arg0, %c0_i32 : i32, i32
  }
}

</mosaic_0001>

<bundles_post_ra>
// kernel: tpu_custom_call.1
= control target key start
LH: loop header
LB: loop body
LE: loop exit
PB: predicated region body
PF: predicated region fallthrough
CT: control target
= control target key end

     0   :  { %7 = vsyncpa [#allocation3], 0  ;;  %s243_s0 = inlined_call_operand.hbm [shape: f32[8,256], index: 0, kind: input, shape index: {}]   ;;  %s244_s1 = inlined_call_operand.hbm [shape: f32[8,256], index: 1, kind: input, shape index: {}]   ;;  %s245_s2 = inlined_call_operand.hbm [shape: f32[8,256], index: 2, kind: output, shape index: {}]  }
   0x1   :  { %8 = vsyncpa [#allocation6], 0 }
   0x2   :  { %9 = vsyncpa [#allocation4], 0  ;;  %s15_s11 = sshll.u32 %s243_s0, 4  ;;  %s215_s12 = smov [#allocation2]   ;;  %s16_s11 = int_to_ptr.hbm [resolvable:$true] %s15_s11 }
   0x3   :  { %s17_s13 = sshll.u32 %s215_s12, 4  ;;  %s26_s16 = sshll.u32 %s244_s1, 4  ;;  %s18_s13 = int_to_ptr.vmem [resolvable:$true] %s17_s13  ;;  %s27_s16 = int_to_ptr.hbm [resolvable:$true] %s26_s16 }
   0x4   :  { %20 = dma.hbm_to_vmem [thread:$0]  %s16_s11, 256, %s18_s13, [#allocation3]  }
   0x5   :  { %s216_s17 = smov [#allocation5]  }
   0x6   :  { %s28_s18 = sshll.u32 %s216_s17, 4  ;;  %s29_s18 = int_to_ptr.vmem [resolvable:$true] %s28_s18 }
   0x7   :  { %31 = dma.hbm_to_vmem [thread:$0]  %s27_s16, 256, %s29_s18, [#allocation6]  }
   0x8   :  { %209 = dma.done.wait [#allocation3], 256  }
   0x9   :  { %210 = vsyncadd [#allocation3], 4294967040 }
   0xa   :  { %211 = dma.done.wait [#allocation6], 256  }
   0xb   :  { %212 = vsyncadd [#allocation6], 4294967040  ;;  %v40_v0 = vld [vmem:[#allocation2] sm:$0xff]  ;;  %v41_v1 = vld [vmem:[#allocation2 + $0x8] sm:$0xff]  ;;  %v217_v6 = vmov 256.0   ;;  %s218_s0 = smov [#allocation7]  }
   0xc   :  { %v44_v2 = vadd.f32 %v41_v1, %v40_v0  ;;  %v42_v3 = vld [vmem:[#allocation5] sm:$0xff]  ;;  %v43_v4 = vld [vmem:[#allocation5 + $0x8] sm:$0xff]  ;;  %131 = vrcp.f32 %v217_v6  ;;  %s114_s1 = sshll.u32 %s218_s0, 4  ;;  %s116_s21 = sshll.u32 %s245_s2, 4  ;;  %s115_s1 = int_to_ptr.vmem [resolvable:$true] %s114_s1  ;;  %s117_s21 = int_to_ptr.hbm [resolvable:$true] %s116_s21 }
   0xd   :  { %v63_v5 = vadd.f32 %v43_v4, %v42_v3 }
   0xe   :  { %45 = vadd.xlane.f32.xlu0 %v44_v2 }
  0x12   :  { %v132_v7 = vpop.eup %131 }
  0x13   :  { %v48_v8 = vmul.f32 256.0, %v132_v7  ;;  %vm52_vm0 = vweird.f32 %v132_v7 }
  0x15   :  { %v49_v9 = vsub.f32 1.0, %v48_v8 }
  0x16   :  { %64 = vadd.xlane.f32.xlu0 %v63_v5 }
  0x17   :  { %v50_v10 = vmul.f32 %v132_v7, %v49_v9 }
  0x19   :  { %v51_v11 = vadd.f32 %v132_v7, %v50_v10 }
  0x1b   :  { %v53_v12 = vsel %vm52_vm0, %v132_v7, %v51_v11 }
  0x81   :  { %v46_v13 = vpop.xlane.xlu0 %45 }
  0x82   :  { %v54_v14 = vmul.f32 %v53_v12, %v46_v13 }
  0x84   :  { %v55_v15 = vsub.f32 %v40_v0, %v54_v14  ;;  %v56_v16 = vsub.f32 %v41_v1, %v54_v14 }
  0x86   :  { %v57_v17 = vmul.f32 %v55_v15, %v55_v15  ;;  %v58_v18 = vmul.f32 %v56_v16, %v56_v16 }
  0x88   :  { %v59_v19 = vadd.f32 %v58_v18, %v57_v17 }
  0x89   :  { %v65_v20 = vpop.xlane.xlu0 %64 }
  0x8a   :  { %60 = vadd.xlane.f32.xlu1 %v59_v19  ;;  %v66_v21 = vmul.f32 %v65_v20, %v53_v12 }
  0x8c   :  { %v67_v22 = vsub.f32 %v42_v3, %v66_v21  ;;  %v68_v23 = vsub.f32 %v43_v4, %v66_v21 }
  0x8e   :  { %v69_v24 = vmul.f32 %v67_v22, %v67_v22  ;;  %v70_v25 = vmul.f32 %v68_v23, %v68_v23 }
  0x90   :  { %v71_v26 = vadd.f32 %v70_v25, %v69_v24 }
  0x92   :  { %72 = vadd.xlane.f32.xlu1 %v71_v26 }
  0xfd   :  { %v61_v27 = vpop.xlane.xlu1 %60 }
  0xfe   :  { %v62_v28 = vmul.f32 %v61_v27, %v53_v12 }
 0x100   :  { %v75_v29 = vadd.f32 1e-05, %v62_v28 }
 0x102   :  { %133 = vrcp.f32 %v75_v29  ;;  %v87_v33 = vand.u32 2147483648, %v75_v29  ;;  %v85_v36 = vand.u32 2147483647, %v75_v29  ;;  %vm81_vm2 = vweird.f32 %v75_v29 }
 0x104   :  { %v88_v39 = vor.u32 1.1754944e-38, %v87_v33  ;;  %vm86_vm4 = vcmp.eq.f32.partialorder %v85_v36, 8.507059e+37 }
 0x105   :  { %v73_v34 = vpop.xlane.xlu1 %72 }
 0x106   :  { %v74_v38 = vmul.f32 0.003921569, %v73_v34 }
 0x108   :  { %v134_v30 = vpop.eup %133 }
 0x109   :  { %v77_v31 = vmul.f32 %v134_v30, %v75_v29  ;;  %vm82_vm1 = vweird.f32 %v134_v30 }
 0x10a   :  { %vm83_vm3 = vmor %vm81_vm2, %vm82_vm1 }
 0x10b   :  { %v78_v32 = vsub.f32 1.0, %v77_v31 }
 0x10d   :  { %v79_v35 = vmul.f32 %v134_v30, %v78_v32 }
 0x10f   :  { %v80_v37 = vadd.f32 %v134_v30, %v79_v35 }
 0x111   :  { %v84_v40 = vsel %vm83_vm3, %v134_v30, %v80_v37 }
 0x112   :  { %v89_v41 = vsel %vm86_vm4, %v88_v39, %v84_v40 }
 0x113   :  { %v90_v42 = vmul.f32 %v89_v41, %v74_v38 }
 0x115   :  { %135 = vrsqrt.f32 %v90_v42  ;;  %vm98_vm5 = vcmp.eq.f32.partialorder %v90_v42, inf  ;;  %v101_v50 = vand.u32 2147483648, %v90_v42  ;;  %vm100_vm6 = vcmp.eq.f32.partialorder %v90_v42, 0.0 }
 0x11b   :  { %v136_v43 = vpop.eup %135 }
 0x11c   :  { %v92_v44 = vmul.f32 %v136_v43, %v90_v42 }
 0x11e   :  { %v93_v45 = vmul.f32 %v136_v43, %v92_v44 }
 0x120   :  { %v94_v46 = vmul.f32 0.5, %v93_v45 }
 0x122   :  { %v95_v47 = vsub.f32 1.5, %v94_v46 }
 0x124   :  { %v96_v48 = vmul.f32 %v136_v43, %v95_v47 }
 0x126   :  { %v97_v49 = vmul.f32 %v96_v48, %v90_v42 }
 0x128   :  { %v99_v51 = vsel %vm98_vm5, %v90_v42, %v97_v49 }
 0x129   :  { %v102_v52 = vsel %vm100_vm6, %v101_v50, %v99_v51 }
 0x12a   :  { %v103_v53 = vmul.f32 %v102_v52, %v55_v15  ;;  %v104_v54 = vmul.f32 %v102_v52, %v56_v16 }
 0x12c   :  { %v105_v55 = vadd.f32 %v103_v53, %v66_v21  ;;  %v106_v56 = vadd.f32 %v104_v54, %v66_v21 }
 0x12e   :  { %107 = vst [vmem:[#allocation7] sm:$0xff] %v105_v55 }
 0x12f   :  { %108 = vst [vmem:[#allocation7 + $0x8] sm:$0xff] %v106_v56 }
 0x130   :  { %119 = dma.vmem_to_hbm [thread:$0]  %s115_s1, 256, %s117_s21, [#allocation4]  }
 0x131   :  { %213 = dma.done.wait [#allocation4], 256  }
 0x132   :  { %214 = vsyncadd [#allocation4], 4294967040 }
 0x133   :  { %124 = vsyncpa [#allocation3], 1 }
 0x134   :  { %125 = vsyncpa [#allocation6], 1 }
 0x135   :  { %126 = vsyncpa [#allocation4], 1 }

</bundles_post_ra>
